<compile_context>
chip_gen: v7x
topology: tpu7x:2x2x1
jax: 0.10.0
libtpu: 0.0.40
codegen_flags: <defaults>
</compile_context>

<pallas_src>
import jax
import jax.numpy as jnp
from jax.experimental import pallas as pl
from jax.experimental.pallas import tpu as pltpu

HID = 128  # hidden width of both hidden layers (fixed by the PyTorch module)


def critic_kernel(x_ref, w1_ref, w2_ref, w3_ref, b_ref, out_ref):
    # x_ref : (TB, IN)   bf16
    # w1_ref: (IN, 128)  bf16
    # w2_ref: (128, 128) bf16
    # w3_ref: (128, 128) bf16  (zero-padded from (128, 1) -> lane-dense output)
    # b_ref : (3, 128)   f32   (row 0 = b1, row 1 = b2, row 2 = [b3, 0, ...])
    # out   : (TB, 128)  f32   (column 0 is the critic value)
    x = x_ref[...]

    h = jnp.dot(x, w1_ref[...], preferred_element_type=jnp.float32)
    h = jnp.maximum(h + b_ref[0:1, :], 0.0)

    h = jnp.dot(h.astype(w2_ref.dtype), w2_ref[...],
                preferred_element_type=jnp.float32)
    h = jnp.maximum(h + b_ref[1:2, :], 0.0)

    out = jnp.dot(h.astype(w3_ref.dtype), w3_ref[...],
                  preferred_element_type=jnp.float32)
    out_ref[...] = (out + b_ref[2:3, :]).astype(out_ref.dtype)


def critic_forward(x, params):
    """x: [B, IN] float32. Returns value: [B, 1] float32."""
    B, IN = x.shape

    # Batch tile: multiple of 8 sublanes, capped at 128 (MXU row width).
    TB = min(128, ((B + 7) // 8) * 8)
    B_pad = ((B + TB - 1) // TB) * TB
    if B_pad != B:
        x = jnp.pad(x, ((0, B_pad - B), (0, 0)))

    # bf16 MXU operands; accumulation stays f32 inside the kernel.
    x_bf = x.astype(jnp.bfloat16)
    w1 = params["w1"].astype(jnp.bfloat16)
    w2 = params["w2"].astype(jnp.bfloat16)
    w3p = params["w3_padded"].astype(jnp.bfloat16)
    b = params["b_packed"]  # (3, HID) f32

    out = pl.pallas_call(
        critic_kernel,
        out_shape=jax.ShapeDtypeStruct((B_pad, HID), jnp.float32),
        grid=(B_pad // TB,),
        in_specs=[
            pl.BlockSpec((TB, IN), lambda i: (i, 0)),    # x tile marches over batch
            pl.BlockSpec((IN, HID), lambda i: (0, 0)),   # weights stay resident
            pl.BlockSpec((HID, HID), lambda i: (0, 0)),
            pl.BlockSpec((HID, HID), lambda i: (0, 0)),
            pl.BlockSpec((3, HID), lambda i: (0, 0)),
        ],
        out_specs=pl.BlockSpec((TB, HID), lambda i: (i, 0)),
        compiler_params=pltpu.CompilerParams(
            dimension_semantics=("parallel",)),
    )(x_bf, w1, w2, w3p, b)

    return out[:B, :1]


def init_params(key, in_dim):
    """Deterministic synthetic parameters matching the Critic's layer shapes."""
    ks = jax.random.split(key, 6)

    def lin(kw, kb, fan_in, fan_out):
        w = jax.random.normal(kw, (fan_in, fan_out), jnp.float32) / jnp.sqrt(fan_in)
        b = jax.random.normal(kb, (fan_out,), jnp.float32) * 0.01
        return w, b

    w1, b1 = lin(ks[0], ks[1], in_dim, HID)
    w2, b2 = lin(ks[2], ks[3], HID, HID)
    w3, b3 = lin(ks[4], ks[5], HID, 1)

    # Zero-pad the (128, 1) head to (128, 128) -> lane-dense output slab.
    w3_padded = jnp.zeros((HID, HID), jnp.float32).at[:, 0:1].set(w3)
    # Pack all biases into one operand; fold the scalar b3 into row 2.
    b3_row = jnp.zeros((HID,), jnp.float32).at[0].set(b3[0])
    b_packed = jnp.stack([b1, b2, b3_row])

    return dict(w1=w1, b1=b1, w2=w2, b2=b2, w3=w3, b3=b3,
                w3_padded=w3_padded, b_packed=b_packed)


def reference_forward(x, p):
    """Pure-JAX reference using the same bf16 matmul / f32 accumulate recipe."""
    h = jnp.dot(x.astype(jnp.bfloat16), p["w1"].astype(jnp.bfloat16),
                preferred_element_type=jnp.float32) + p["b1"]
    h = jnp.maximum(h, 0.0)
    h = jnp.dot(h.astype(jnp.bfloat16), p["w2"].astype(jnp.bfloat16),
                preferred_element_type=jnp.float32) + p["b2"]
    h = jnp.maximum(h, 0.0)
    v = jnp.dot(h.astype(jnp.bfloat16), p["w3"].astype(jnp.bfloat16),
                preferred_element_type=jnp.float32) + p["b3"]
    return v


if __name__ == "__main__":
    # Critic(in_size=32); the torch forward runs batch=1 (unsqueeze(0)); any
    # batch works here — use a small one.
    B, IN = 4, 32

    key = jax.random.PRNGKey(0)
    kx, kp = jax.random.split(key)
    x = jax.random.normal(kx, (B, IN), jnp.float32)
    params = init_params(kp, IN)

    value = critic_forward(x, params)
    value = jax.block_until_ready(value)

    v_ref = reference_forward(x, params)
    assert value.shape == (B, 1)
    assert jnp.allclose(value, v_ref, atol=1e-2, rtol=1e-2), float(
        jnp.max(jnp.abs(value - v_ref)))

    print("KERNEL_OK")
</pallas_src>

<mosaic_0001>
module attributes {stable_mosaic.version = 11 : i64} {
  func.func @critic_kernel(%arg0: i32, %arg1: memref<8x32xbf16, #tpu.memory_space<vmem>>, %arg2: memref<32x128xbf16, #tpu.memory_space<vmem>>, %arg3: memref<128x128xbf16, #tpu.memory_space<vmem>>, %arg4: memref<128x128xbf16, #tpu.memory_space<vmem>>, %arg5: memref<3x128xf32, #tpu.memory_space<vmem>>, %arg6: memref<8x128xf32, #tpu.memory_space<vmem>>) attributes {dimension_semantics = [#tpu.dimension_semantics<parallel>], iteration_bounds = array<i64: 1>, scalar_prefetch = 0 : i64, scratch_operands = 0 : i64, tpu.core_type = #tpu.core_type<tc>, window_params = [{transform_indices = @transform_0, window_bounds = array<i64: 8, 32>}, {pipeline_mode = #tpu.pipeline_mode<synchronous>, transform_indices = @transform_1, window_bounds = array<i64: 32, 128>}, {pipeline_mode = #tpu.pipeline_mode<synchronous>, transform_indices = @transform_2, window_bounds = array<i64: 128, 128>}, {pipeline_mode = #tpu.pipeline_mode<synchronous>, transform_indices = @transform_3, window_bounds = array<i64: 128, 128>}, {pipeline_mode = #tpu.pipeline_mode<synchronous>, transform_indices = @transform_4, window_bounds = array<i64: 3, 128>}, {transform_indices = @transform_5, window_bounds = array<i64: 8, 128>}]} {
    %c0 = arith.constant 0 : index
    %c0_0 = arith.constant 0 : index
    %0 = vector.load %arg1[%c0, %c0_0] : memref<8x32xbf16, #tpu.memory_space<vmem>>, vector<8x32xbf16>
    %c0_1 = arith.constant 0 : index
    %c0_2 = arith.constant 0 : index
    %1 = vector.load %arg2[%c0_1, %c0_2] : memref<32x128xbf16, #tpu.memory_space<vmem>>, vector<32x128xbf16>
    %cst = arith.constant dense<0.000000e+00> : vector<8x128xf32>
    %2 = tpu.matmul %0, %1, %cst {dimension_numbers = #tpu.dot_dimension_numbers<[1], [0], [0], [1], [0, 0, 1, 1], [], []>} : vector<8x32xbf16>, vector<32x128xbf16>, vector<8x128xf32> -> vector<8x128xf32>
    %c0_3 = arith.constant 0 : index
    %c0_4 = arith.constant 0 : index
    %3 = vector.load %arg5[%c0_3, %c0_4] : memref<3x128xf32, #tpu.memory_space<vmem>>, vector<1x128xf32>
    %4 = vector.broadcast %3 : vector<1x128xf32> to vector<8x128xf32>
    %5 = arith.addf %2, %4 : vector<8x128xf32>
    %cst_5 = arith.constant 0.000000e+00 : f32
    %6 = vector.broadcast %cst_5 : f32 to vector<8x128xf32>
    %7 = arith.maximumf %5, %6 : vector<8x128xf32>
    %8 = arith.truncf %7 : vector<8x128xf32> to vector<8x128xbf16>
    %c0_6 = arith.constant 0 : index
    %c0_7 = arith.constant 0 : index
    %9 = vector.load %arg3[%c0_6, %c0_7] : memref<128x128xbf16, #tpu.memory_space<vmem>>, vector<128x128xbf16>
    %cst_8 = arith.constant dense<0.000000e+00> : vector<8x128xf32>
    %10 = tpu.matmul %8, %9, %cst_8 {dimension_numbers = #tpu.dot_dimension_numbers<[1], [0], [0], [1], [0, 0, 1, 1], [], []>} : vector<8x128xbf16>, vector<128x128xbf16>, vector<8x128xf32> -> vector<8x128xf32>
    %c1 = arith.constant 1 : index
    %c0_9 = arith.constant 0 : index
    %11 = vector.load %arg5[%c1, %c0_9] : memref<3x128xf32, #tpu.memory_space<vmem>>, vector<1x128xf32>
    %12 = vector.broadcast %11 : vector<1x128xf32> to vector<8x128xf32>
    %13 = arith.addf %10, %12 : vector<8x128xf32>
    %cst_10 = arith.constant 0.000000e+00 : f32
    %14 = vector.broadcast %cst_10 : f32 to vector<8x128xf32>
    %15 = arith.maximumf %13, %14 : vector<8x128xf32>
    %16 = arith.truncf %15 : vector<8x128xf32> to vector<8x128xbf16>
    %c0_11 = arith.constant 0 : index
    %c0_12 = arith.constant 0 : index
    %17 = vector.load %arg4[%c0_11, %c0_12] : memref<128x128xbf16, #tpu.memory_space<vmem>>, vector<128x128xbf16>
    %cst_13 = arith.constant dense<0.000000e+00> : vector<8x128xf32>
    %18 = tpu.matmul %16, %17, %cst_13 {dimension_numbers = #tpu.dot_dimension_numbers<[1], [0], [0], [1], [0, 0, 1, 1], [], []>} : vector<8x128xbf16>, vector<128x128xbf16>, vector<8x128xf32> -> vector<8x128xf32>
    %c2 = arith.constant 2 : index
    %c0_14 = arith.constant 0 : index
    %19 = vector.load %arg5[%c2, %c0_14] : memref<3x128xf32, #tpu.memory_space<vmem>>, vector<1x128xf32>
    %20 = vector.broadcast %19 : vector<1x128xf32> to vector<8x128xf32>
    %21 = arith.addf %18, %20 : vector<8x128xf32>
    %c0_15 = arith.constant 0 : index
    %c0_16 = arith.constant 0 : index
    %22 = vector.load %arg6[%c0_15, %c0_16] : memref<8x128xf32, #tpu.memory_space<vmem>>, vector<8x128xf32>
    tpu.vector_store %arg6[%c0_15, %c0_16], %21 {strides = array<i32>} : memref<8x128xf32, #tpu.memory_space<vmem>>, vector<8x128xf32>,
    return
  }
  func.func @transform_0(%arg0: i32) -> (i32, i32) {
    %c0_i32 = arith.constant 0 : i32
    %c0_i32_0 = arith.constant 0 : i32
    return %arg0, %c0_i32 : i32, i32
  }
  func.func @transform_1(%arg0: i32) -> (i32, i32) {
    %c0_i32 = arith.constant 0 : i32
    %c0_i32_0 = arith.constant 0 : i32
    %c0_i32_1 = arith.constant 0 : i32
    return %c0_i32, %c0_i32_0 : i32, i32
  }
  func.func @transform_2(%arg0: i32) -> (i32, i32) {
    %c0_i32 = arith.constant 0 : i32
    %c0_i32_0 = arith.constant 0 : i32
    %c0_i32_1 = arith.constant 0 : i32
    return %c0_i32, %c0_i32_0 : i32, i32
  }
  func.func @transform_3(%arg0: i32) -> (i32, i32) {
    %c0_i32 = arith.constant 0 : i32
    %c0_i32_0 = arith.constant 0 : i32
    %c0_i32_1 = arith.constant 0 : i32
    return %c0_i32, %c0_i32_0 : i32, i32
  }
  func.func @transform_4(%arg0: i32) -> (i32, i32) {
    %c0_i32 = arith.constant 0 : i32
    %c0_i32_0 = arith.constant 0 : i32
    %c0_i32_1 = arith.constant 0 : i32
    return %c0_i32, %c0_i32_0 : i32, i32
  }
  func.func @transform_5(%arg0: i32) -> (i32, i32) {
    %c0_i32 = arith.constant 0 : i32
    %c0_i32_0 = arith.constant 0 : i32
    return %arg0, %c0_i32 : i32, i32
  }
}

</mosaic_0001>

<bundles_post_ra>
// kernel: tpu_custom_call.1
= control target key start
LH: loop header
LB: loop body
LE: loop exit
PB: predicated region body
PF: predicated region fallthrough
CT: control target
= control target key end

     0   :  { %10 = vsyncpa [#allocation3], 0  ;;  %s758_s0 = inlined_call_operand.hbm [shape: bf16[8,32], index: 0, kind: input, shape index: {}]   ;;  %s759_s1 = inlined_call_operand.hbm [shape: bf16[32,128], index: 1, kind: input, shape index: {}]   ;;  %s760_s2 = inlined_call_operand.hbm [shape: bf16[128,128], index: 2, kind: input, shape index: {}]   ;;  %s761_s3 = inlined_call_operand.hbm [shape: bf16[128,128], index: 3, kind: input, shape index: {}]   ;;  %s762_s4 = inlined_call_operand.vmem [shape: f32[3,128], index: 4, kind: input, shape index: {}]   ;;  %s763_s5 = inlined_call_operand.hbm [shape: f32[8,128], index: 5, kind: output, shape index: {}]  }
   0x1   :  { %11 = vsyncpa [#allocation6], 0 }
   0x2   :  { %12 = vsyncpa [#allocation9], 0 }
   0x3   :  { %13 = vsyncpa [#allocation4], 0  ;;  %s617_s18 = smov [#allocation5]   ;;  %s499_s22 = scalar_lea.hbm %s759_s1, 256 }
   0x4   :  { %s29_s19 = sshll.u32 %s617_s18, 4  ;;  %p500_p0 = scmp.ne.s32.totalorder %s759_s1, %s499_s22  ;;  %s30_s19 = int_to_ptr.vmem [resolvable:$true] %s29_s19 }
   0x5   :  { %p503_p1 = scmp.lt.u32.totalorder %s499_s22, %s759_s1 }
   0x7   :  { %p505_p2 = pnand %p503_p1, %p500_p0 }
   0x9   :  { %508 = shalt.err (!%p505_p2)
}
   0xa   :  { %s509_s27 = scalar_lea.vmem %s30_s19, 256  ;;  %p514_p4 = scmp.lt.s32.totalorder %s30_s19, %s30_s19 }
   0xb   :  { %p510_p3 = scmp.ne.s32.totalorder %s30_s19, %s509_s27  ;;  %p515_p5 = scmp.lt.s32.totalorder %s509_s27, %s509_s27 }
   0xd   :  { %p516_p6 = por %p515_p5, %p514_p4 }
   0xf   :  { %p517_p7 = pnand %p516_p6, %p510_p3 }
  0x11   :  { %520 = shalt.err (!%p517_p7)
}
  0x12   :  { %s618_s28 = smov 64   ;;  %s619_s29 = smov 4  }
  0x13   :  { %35 = dma.hbm_to_vmem [thread:$0]  %s759_s1, 256, %s30_s19, [#allocation6], %s618_s28, %s618_s28, %s619_s29  }
  0x14   :  { %s620_s7 = smov [#allocation2]   ;;  %s621_s9 = smov [#allocation7]  }
  0x15   :  { %s20_s8 = sshll.u32 %s620_s7, 4  ;;  %s41_s10 = sshll.u32 %s621_s9, 4  ;;  %s21_s8 = int_to_ptr.vmem [resolvable:$true] %s20_s8  ;;  %s42_s10 = int_to_ptr.vmem [resolvable:$true] %s41_s10 }
  0x16   :  { %s521_s13 = scalar_lea.hbm %s758_s0, 64 }
  0x17   :  { %p522_p8 = scmp.ne.s32.totalorder %s758_s0, %s521_s13  ;;  %p525_p9 = scmp.lt.u32.totalorder %s521_s13, %s758_s0 }
  0x19   :  { %p527_p10 = pnand %p525_p9, %p522_p8 }
  0x1b   :  { %530 = shalt.err (!%p527_p10)
}
  0x1c   :  { %s531_s1 = scalar_lea.vmem %s21_s8, 64  ;;  %p536_p12 = scmp.lt.s32.totalorder %s21_s8, %s21_s8 }
  0x1d   :  { %p532_p11 = scmp.ne.s32.totalorder %s21_s8, %s531_s1  ;;  %p537_p13 = scmp.lt.s32.totalorder %s531_s1, %s531_s1 }
  0x1f   :  { %p538_p0 = por %p537_p13, %p536_p12 }
  0x21   :  { %p539_p1 = pnand %p538_p0, %p532_p11 }
  0x23   :  { %542 = shalt.err (!%p539_p1)
}
  0x24   :  { %23 = dma.hbm_to_vmem [thread:$0]  %s758_s0, 64, %s21_s8, [#allocation3]  }
  0x25   :  { %s543_s22 = scalar_lea.hbm %s760_s2, 1024 }
  0x26   :  { %p544_p2 = scmp.ne.s32.totalorder %s760_s2, %s543_s22  ;;  %p547_p3 = scmp.lt.u32.totalorder %s543_s22, %s760_s2 }
  0x28   :  { %p549_p4 = pnand %p547_p3, %p544_p2 }
  0x2a   :  { %552 = shalt.err (!%p549_p4)
}
  0x2b   :  { %s553_s27 = scalar_lea.vmem %s42_s10, 1024  ;;  %p558_p6 = scmp.lt.s32.totalorder %s42_s10, %s42_s10 }
  0x2c   :  { %p554_p5 = scmp.ne.s32.totalorder %s42_s10, %s553_s27  ;;  %p559_p7 = scmp.lt.s32.totalorder %s553_s27, %s553_s27 }
  0x2e   :  { %p560_p8 = por %p559_p7, %p558_p6 }
  0x30   :  { %p561_p9 = pnand %p560_p8, %p554_p5 }
  0x32   :  { %564 = shalt.err (!%p561_p9)
}
  0x33   :  { %47 = dma.hbm_to_vmem [thread:$0]  %s760_s2, 1024, %s42_s10, [#allocation6], %s618_s28, %s618_s28, %s619_s29  }
  0x34   :  { %s622_s6 = smov [#allocation8]   ;;  %s565_s11 = scalar_lea.hbm %s761_s3, 1024 }
  0x35   :  { %s53_s7 = sshll.u32 %s622_s6, 4  ;;  %p566_p10 = scmp.ne.s32.totalorder %s761_s3, %s565_s11  ;;  %s54_s7 = int_to_ptr.vmem [resolvable:$true] %s53_s7 }
  0x36   :  { %p569_p11 = scmp.lt.u32.totalorder %s565_s11, %s761_s3 }
  0x38   :  { %p571_p12 = pnand %p569_p11, %p566_p10 }
  0x3a   :  { %574 = shalt.err (!%p571_p12)
}
  0x3b   :  { %s575_s16 = scalar_lea.vmem %s54_s7, 1024  ;;  %p580_p0 = scmp.lt.s32.totalorder %s54_s7, %s54_s7 }
  0x3c   :  { %p576_p13 = scmp.ne.s32.totalorder %s54_s7, %s575_s16  ;;  %p581_p1 = scmp.lt.s32.totalorder %s575_s16, %s575_s16 }
  0x3e   :  { %p582_p2 = por %p581_p1, %p580_p0 }
  0x40   :  { %p583_p3 = pnand %p582_p2, %p576_p13 }
  0x42   :  { %586 = shalt.err (!%p583_p3)
}
  0x43   :  { %59 = dma.hbm_to_vmem [thread:$0]  %s761_s3, 1024, %s54_s7, [#allocation9], %s618_s28, %s618_s28, %s619_s29  }
  0x44   :  { %609 = dma.done.wait [#allocation3], 64  }
  0x45   :  { %610 = vsyncadd [#allocation3], 4294967232 }
  0x46   :  { %611 = dma.done.wait [#allocation6], 1280  }
  0x47   :  { %612 = vsyncadd [#allocation6], 4294966016 }
  0x48   :  { %613 = dma.done.wait [#allocation9], 1024  }
  0x49   :  { %614 = vsyncadd [#allocation9], 4294966272  ;;  %v623_v0 = vmov 0.0   ;;  %vm624_vm0 = vmmov 0   ;;  %v481_v1 = vld [vmem:[#allocation5] sm:$0xff]   ;;  %v482_v2 = vld [vmem:[#allocation5 + $0x8] sm:$0xff]  }
  0x4a   :  { %424 = vmatprep.subr.bf16.mxu0 %v623_v0  ;;  %428 = vmatprep.mubr.msk.bf16.mxu0 %vm624_vm0, %v623_v0  ;;  %v483_v3 = vld [vmem:[#allocation7] sm:$0xff]   ;;  %vm97_vm1 = vcmask 261120   ;;  %v484_v4 = vld [vmem:[#allocation7 + $0x8] sm:$0xff]   ;;  %v485_v6 = vld [vmem:[#allocation7 + $0x10] sm:$0xff]   ;;  %s625_s19 = smov [#allocation10]  }
  0x4b   :  { %432 = vmatprep.subr.bf16.mxu1 %v623_v0  ;;  %448 = vmatprep.mubr.msk.bf16.mxu1 %vm624_vm0, %v623_v0  ;;  %v75_v5 = vld [vmem:[#allocation2] sm:$0xf]  ;;  %v486_v7 = vld [vmem:[#allocation7 + $0x18] sm:$0xff]   ;;  %v487_v8 = vld [vmem:[#allocation7 + $0x20] sm:$0xff]   ;;  %s370_s20 = sshll.u32 %s625_s19, 4  ;;  %s371_s20 = int_to_ptr.vmem [resolvable:$true] %s370_s20 }
  0x4c   :  { %425 = vmatpush3.bf16.msra.mxu0 %v481_v1  ;;  %433 = vmatpush3.bf16.msra.mxu1 %v483_v3  ;;  %v488_v9 = vld [vmem:[#allocation7 + $0x28] sm:$0xff]   ;;  %v489_v10 = vld [vmem:[#allocation7 + $0x30] sm:$0xff]   ;;  %v490_v11 = vld [vmem:[#allocation7 + $0x38] sm:$0xff]   ;;  %s587_s21 = scalar_lea.vmem %s371_s20, 128  ;;  %p592_p5 = scmp.lt.s32.totalorder %s371_s20, %s371_s20 }
  0x4d   :  { %426 = vmatprep.subr.bf16.mxu0 %v623_v0  ;;  %434 = vmatprep.subr.bf16.mxu1 %v623_v0  ;;  %v491_v12 = vld [vmem:[#allocation8] sm:$0xff]   ;;  %v492_v13 = vld [vmem:[#allocation8 + $0x8] sm:$0xff]   ;;  %v493_v14 = vld [vmem:[#allocation8 + $0x10] sm:$0xff]   ;;  %p588_p4 = scmp.ne.s32.totalorder %s371_s20, %s587_s21  ;;  %p593_p6 = scmp.lt.s32.totalorder %s587_s21, %s587_s21 }
  0x4e   :  { %v494_v15 = vld [vmem:[#allocation8 + $0x18] sm:$0xff]   ;;  %v495_v16 = vld [vmem:[#allocation8 + $0x20] sm:$0xff]   ;;  %v496_v17 = vld [vmem:[#allocation8 + $0x28] sm:$0xff]  }
  0x4f   :  { %v381_v18 = vld [vmem:[%s762_s4] ss:$0 sm:$0xff]  ;;  %v497_v26 = vld [vmem:[#allocation8 + $0x30] sm:$0xff]   ;;  %v498_v27 = vld [vmem:[#allocation8 + $0x38] sm:$0xff]   ;;  %p594_p7 = por %p593_p6, %p592_p5 }
  0x50   :  { %427 = vmatpush3.bf16.msra.mxu0 %v482_v2  ;;  %435 = vmatpush3.bf16.msra.mxu1 %v484_v4  ;;  %v385_v28 = vld [vmem:[%s762_s4 + $0x1] ss:$0 sm:$0xff]  ;;  %v394_v36 = vld [vmem:[%s762_s4 + $0x2] ss:$0 sm:$0xff] }
  0x51   :  { %452 = vmatprep.subr.bf16.mxu0 %v623_v0  ;;  %436 = vmatprep.subr.bf16.mxu1 %v623_v0  ;;  %p595_p8 = pnand %p594_p7, %p588_p4 }
  0x53   :  { %429 = vmatmul.mubr.msk.bf16.vlgmr.msra.gmra.mrb[0].mxu0 %vm97_vm1, %v75_v5 }
  0x54   :  { %468 = vmatprep.mubr.msk.bf16.mxu0 %vm624_vm0, %v623_v0  ;;  %437 = vmatpush3.bf16.msra.mxu1 %v485_v6 }
  0x55   :  { %438 = vmatprep.subr.bf16.mxu1 %v623_v0  ;;  %453 = vmatpush3.bf16.msra.mxu0 %v491_v12 }
  0x56   :  { %454 = vmatprep.subr.bf16.mxu0 %v623_v0 }
  0x58   :  { %439 = vmatpush3.bf16.msra.mxu1 %v486_v7 }
  0x59   :  { %440 = vmatprep.subr.bf16.mxu1 %v623_v0  ;;  %455 = vmatpush3.bf16.msra.mxu0 %v492_v13 }
  0x5a   :  { %456 = vmatprep.subr.bf16.mxu0 %v623_v0 }
  0x5c   :  { %441 = vmatpush3.bf16.msra.mxu1 %v487_v8 }
  0x5d   :  { %442 = vmatprep.subr.bf16.mxu1 %v623_v0  ;;  %457 = vmatpush3.bf16.msra.mxu0 %v493_v14 }
  0x5e   :  { %458 = vmatprep.subr.bf16.mxu0 %v623_v0 }
  0x60   :  { %443 = vmatpush3.bf16.msra.mxu1 %v488_v9 }
  0x61   :  { %444 = vmatprep.subr.bf16.mxu1 %v623_v0  ;;  %459 = vmatpush3.bf16.msra.mxu0 %v494_v15 }
  0x62   :  { %460 = vmatprep.subr.bf16.mxu0 %v623_v0 }
  0x64   :  { %445 = vmatpush3.bf16.msra.mxu1 %v489_v10 }
  0x65   :  { %446 = vmatprep.subr.bf16.mxu1 %v623_v0  ;;  %461 = vmatpush3.bf16.msra.mxu0 %v495_v16 }
  0x66   :  { %462 = vmatprep.subr.bf16.mxu0 %v623_v0 }
  0x68   :  { %447 = vmatpush3.bf16.msra.mxu1 %v490_v11 }
  0x69   :  { %463 = vmatpush3.bf16.msra.mxu0 %v496_v17 }
  0x6a   :  { %464 = vmatprep.subr.bf16.mxu0 %v623_v0 }
  0x6d   :  { %465 = vmatpush3.bf16.msra.mxu0 %v497_v26 }
  0x6e   :  { %466 = vmatprep.subr.bf16.mxu0 %v623_v0 }
  0x71   :  { %467 = vmatpush3.bf16.msra.mxu0 %v498_v27 }
 0x126   :  { %v135_v19 = vpop.f32.mrb[0].mxu0 }
 0x127   :  { %v136_v20 = vadd.f32 %v381_v18, %v135_v19  ;;  %v430_v21 = vpop.f32.mrb[1].mxu0 }
 0x128   :  { %v138_v22 = vpop.f32.mrb[2].mxu0 }
 0x129   :  { %v141_v23 = vmax.f32 %v136_v20, 0.0  ;;  %v431_v24 = vpop.f32.mrb[3].mxu0 }
 0x12b   :  { %v142_v25 = vpack.c.bf16 %v141_v23, %v141_v23 }
 0x12d   :  { %449 = vmatmul.mubr.bf16.vlgmr.msra.gmra.mrb[0].mxu1 %v142_v25 }
 0x200   :  { %v246_v29 = vpop.f32.mrb[0].mxu1 }
 0x201   :  { %v247_v30 = vadd.f32 %v385_v28, %v246_v29  ;;  %v450_v31 = vpop.f32.mrb[1].mxu1 }
 0x202   :  { %v249_v32 = vpop.f32.mrb[2].mxu1 }
 0x203   :  { %v252_v33 = vmax.f32 %v247_v30, 0.0  ;;  %v451_v34 = vpop.f32.mrb[3].mxu1 }
 0x205   :  { %v253_v35 = vpack.c.bf16 %v252_v33, %v252_v33 }
 0x207   :  { %469 = vmatmul.mubr.bf16.vlgmr.msra.gmra.mrb[4].mxu0 %v253_v35 }
 0x2da   :  { %v357_v37 = vpop.f32.mrb[4].mxu0 }
 0x2db   :  { %v358_v38 = vadd.f32 %v394_v36, %v357_v37  ;;  %v470_v39 = vpop.f32.mrb[5].mxu0 }
 0x2dc   :  { %v360_v40 = vpop.f32.mrb[6].mxu0 }
 0x2dd   :  { %363 = vst [vmem:[#allocation10] sm:$0xff] %v358_v38  ;;  %v471_v41 = vpop.f32.mrb[7].mxu0 }
 0x2de   :  { %598 = shalt.err (!%p595_p8)
}
 0x2df   :  { %s599_s4 = scalar_lea.hbm %s763_s5, 128 }
 0x2e0   :  { %p600_p9 = scmp.ne.s32.totalorder %s763_s5, %s599_s4  ;;  %p603_p10 = scmp.lt.u32.totalorder %s599_s4, %s763_s5 }
 0x2e2   :  { %p605_p11 = pnand %p603_p10, %p600_p9 }
 0x2e4   :  { %608 = shalt.err (!%p605_p11)
}
 0x2e5   :  { %373 = dma.vmem_to_hbm [thread:$0]  %s371_s20, 128, %s763_s5, [#allocation4]  }
 0x2e6   :  { %615 = dma.done.wait [#allocation4], 128  }
 0x2e7   :  { %616 = vsyncadd [#allocation4], 4294967168 }
 0x2e8   :  { %377 = vsyncpa [#allocation3], 1 }
 0x2e9   :  { %378 = vsyncpa [#allocation6], 1 }
 0x2ea   :  { %379 = vsyncpa [#allocation9], 1 }
 0x2eb   :  { %380 = vsyncpa [#allocation4], 1 }

</bundles_post_ra>
